<compile_context>
chip_gen: v7x
topology: tpu7x:2x2x1
jax: 0.10.0
libtpu: 0.0.40
codegen_flags: <defaults>
</compile_context>

<pallas_src>
import functools

import jax
import jax.numpy as jnp
import numpy as np
from jax.experimental import pallas as pl
from jax.experimental.pallas import tpu as pltpu


# ----------------------------- schedules (glue) -----------------------------
def ddpm_schedules(beta1: float, beta2: float, T: int):
    beta_t = jnp.linspace(beta1, beta2, T + 1, dtype=jnp.float32)
    alpha_t = 1.0 - beta_t
    alphabar = jnp.exp(jnp.cumsum(jnp.log(alpha_t)))
    return {
        "alphabar_sqrt": jnp.sqrt(alphabar),
        "sqrtmab": jnp.sqrt(1.0 - alphabar),
    }


# ------------------------------- Pallas kernel -------------------------------
def ddpm_loss_kernel(x_ref, eps_ref,        # VMEM: (B*C, HW)  sublane-packed slabs
                     a_ref, s_ref,          # VMEM: (B*C, 1)   per-row noising coefs
                     w1_ref,                # VMEM: (B*Ch, B*C)  block-diag w1^T
                     b1_ref,                # VMEM: (B*Ch, 1)    b1 + temb (folded)
                     w2_ref,                # VMEM: (B*C, B*Ch)  block-diag w2^T
                     b2_ref,                # VMEM: (B*C, 1)
                     out_ref,               # VMEM: (1, 1) mean squared error
                     *, inv_total):
    x = x_ref[...]                          # (B*C, HW) -- full (8,128) vregs
    eps = eps_ref[...]                      # (B*C, HW)

    # q(x_t | x_0): one slab FMA; coefficient columns broadcast along lanes.
    x_t = a_ref[...] * x + s_ref[...] * eps                              # (B*C, HW)

    # stand-in UNet, batch-fused:
    #   one MXU dot per layer via block-diagonal weights (review #2).
    h = jnp.dot(w1_ref[...], x_t, preferred_element_type=jnp.float32)    # (B*Ch, HW)
    h = h + b1_ref[...]                     # per-sample (b1 + temb) bias column
    h = h * jax.nn.sigmoid(h)               # SiLU (EUP)
    res = jnp.dot(w2_ref[...], h, preferred_element_type=jnp.float32)    # (B*C, HW)
    res = res + b2_ref[...]

    # MSE: slab diff^2, then a single deferred reduction (review #4).
    diff = eps - res
    out_ref[...] = jnp.sum(diff * diff, keepdims=True) * inv_total


# --------------------------------- wrapper -----------------------------------
def ddpm_forward_loss(x_nchw, ts, eps_nchw, params, sched, T):
    B, C, H, W = x_nchw.shape
    HW = H * W
    Ch = params["w1"].shape[1]

    # FREE reshape: NCHW -> (B*C, HW).  Sublanes fully packed (8 rows), HW = 256
    # on the lane axis (multiple of 128).  (review #1)
    x = x_nchw.reshape(B * C, HW).astype(jnp.float32)
    eps = eps_nchw.reshape(B * C, HW).astype(jnp.float32)

    # per-sample noising coefficients, expanded to per-row columns (glue gather)
    a = sched["alphabar_sqrt"][ts].astype(jnp.float32)        # (B,)
    s = sched["sqrtmab"][ts].astype(jnp.float32)              # (B,)
    a_col = jnp.repeat(a, C).reshape(B * C, 1)                # (B*C, 1)
    s_col = jnp.repeat(s, C).reshape(B * C, 1)                # (B*C, 1)

    # tiny time MLP on ts/T (glue; negligible compute)
    t_norm = ts.astype(jnp.float32) / float(T)                            # (B,)
    temb = t_norm[:, None] @ params["wt1"] + params["bt1"]                # (B, Ch)
    temb = jax.nn.silu(temb) @ params["wt2"] + params["bt2"]              # (B, Ch)

    # Lift shared 1x1-conv weights to block-diagonal form so the whole batch is
    # one matmul per layer (review #2).  Fold time embedding into bias1.
    eye_b = jnp.eye(B, dtype=jnp.float32)
    w1bd = jnp.kron(eye_b, params["w1"].T)                                # (B*Ch, B*C)
    w2bd = jnp.kron(eye_b, params["w2"].T)                                # (B*C, B*Ch)
    b1_col = (params["b1"][None, :] + temb).reshape(B * Ch, 1)            # (B*Ch, 1)
    b2_col = jnp.tile(params["b2"], B).reshape(B * C, 1)                  # (B*C, 1)

    kernel = functools.partial(
        ddpm_loss_kernel, inv_total=1.0 / float(B * C * HW))

    vmem = pl.BlockSpec(memory_space=pltpu.MemorySpace.VMEM)

    # Single grid step: whole (tiny) problem resident in VMEM (~70 KiB).
    # TODO(synk): at real sizes, tile HW / batch with a grid + 'parallel'
    #             dimension_semantics (2nd TC on v7x) and re-budget for 64 MiB VMEM.
    out = pl.pallas_call(
        kernel,
        out_shape=jax.ShapeDtypeStruct((1, 1), jnp.float32),
        in_specs=[vmem, vmem, vmem, vmem, vmem, vmem, vmem, vmem],
        out_specs=vmem,
    )(x, eps, a_col, s_col, w1bd, b1_col, w2bd, b2_col)
    return out[0, 0]


# ------------------------ pure-JAX reference (sanity) ------------------------
def ddpm_forward_loss_ref(x_nchw, ts, eps_nchw, params, sched, T):
    B, C, H, W = x_nchw.shape
    a = sched["alphabar_sqrt"][ts][:, None, None, None]
    s = sched["sqrtmab"][ts][:, None, None, None]
    x_t = a * x_nchw + s * eps_nchw
    t_norm = ts.astype(jnp.float32) / float(T)
    temb = t_norm[:, None] @ params["wt1"] + params["bt1"]
    temb = jax.nn.silu(temb) @ params["wt2"] + params["bt2"]              # (B, Ch)
    xf = jnp.transpose(x_t, (0, 2, 3, 1)).reshape(B, H * W, C)
    h = xf @ params["w1"] + params["b1"][None, None, :] + temb[:, None, :]
    h = jax.nn.silu(h)
    res = h @ params["w2"] + params["b2"][None, None, :]
    epsf = jnp.transpose(eps_nchw, (0, 2, 3, 1)).reshape(B, H * W, C)
    return jnp.mean((epsf - res) ** 2)


if __name__ == "__main__":
    B, C, H, W = 2, 4, 16, 16
    Ch = 32
    T = 100
    beta1, beta2 = 1e-4, 0.02

    key = jax.random.PRNGKey(0)
    kx, kts, keps, k1, k2, k3, k4 = jax.random.split(key, 7)

    x = jax.random.normal(kx, (B, C, H, W), dtype=jnp.float32)
    ts = jax.random.randint(kts, (B,), 1, T + 1)                 # in [1, T]
    epsilon = jax.random.normal(keps, (B, C, H, W), dtype=jnp.float32)

    params = {
        "w1": 0.1 * jax.random.normal(k1, (C, Ch), dtype=jnp.float32),
        "b1": jnp.zeros((Ch,), dtype=jnp.float32),
        "w2": 0.1 * jax.random.normal(k2, (Ch, C), dtype=jnp.float32),
        "b2": jnp.zeros((C,), dtype=jnp.float32),
        "wt1": 0.1 * jax.random.normal(k3, (1, Ch), dtype=jnp.float32),
        "bt1": jnp.zeros((Ch,), dtype=jnp.float32),
        "wt2": 0.1 * jax.random.normal(k4, (Ch, Ch), dtype=jnp.float32),
        "bt2": jnp.zeros((Ch,), dtype=jnp.float32),
    }

    sched = ddpm_schedules(beta1, beta2, T)

    loss = ddpm_forward_loss(x, ts, epsilon, params, sched, T)
    loss = jax.block_until_ready(loss)

    loss_ref = jax.block_until_ready(
        ddpm_forward_loss_ref(x, ts, epsilon, params, sched, T))
    assert np.allclose(np.asarray(loss), np.asarray(loss_ref), rtol=1e-3, atol=1e-4), (
        loss, loss_ref)

    print("KERNEL_OK")
</pallas_src>

<mosaic_0001>
module attributes {stable_mosaic.version = 11 : i64} {
  func.func @ddpm_loss_kernel(%arg0: memref<8x256xf32, #tpu.memory_space<vmem>>, %arg1: memref<8x256xf32, #tpu.memory_space<vmem>>, %arg2: memref<8x1xf32, #tpu.memory_space<vmem>>, %arg3: memref<8x1xf32, #tpu.memory_space<vmem>>, %arg4: memref<64x8xf32, #tpu.memory_space<vmem>>, %arg5: memref<64x1xf32, #tpu.memory_space<vmem>>, %arg6: memref<8x64xf32, #tpu.memory_space<vmem>>, %arg7: memref<8x1xf32, #tpu.memory_space<vmem>>, %arg8: memref<1x1xf32, #tpu.memory_space<vmem>>) attributes {dimension_semantics = [], scalar_prefetch = 0 : i64, scratch_operands = 0 : i64, tpu.core_type = #tpu.core_type<tc>} {
    %c0 = arith.constant 0 : index
    %c0_0 = arith.constant 0 : index
    %0 = vector.load %arg0[%c0, %c0_0] : memref<8x256xf32, #tpu.memory_space<vmem>>, vector<8x256xf32>
    %c0_1 = arith.constant 0 : index
    %c0_2 = arith.constant 0 : index
    %1 = vector.load %arg1[%c0_1, %c0_2] : memref<8x256xf32, #tpu.memory_space<vmem>>, vector<8x256xf32>
    %c0_3 = arith.constant 0 : index
    %c0_4 = arith.constant 0 : index
    %2 = vector.load %arg2[%c0_3, %c0_4] : memref<8x1xf32, #tpu.memory_space<vmem>>, vector<8x1xf32>
    %3 = vector.broadcast %2 : vector<8x1xf32> to vector<8x256xf32>
    %4 = arith.mulf %3, %0 : vector<8x256xf32>
    %c0_5 = arith.constant 0 : index
    %c0_6 = arith.constant 0 : index
    %5 = vector.load %arg3[%c0_5, %c0_6] : memref<8x1xf32, #tpu.memory_space<vmem>>, vector<8x1xf32>
    %6 = vector.broadcast %5 : vector<8x1xf32> to vector<8x256xf32>
    %7 = arith.mulf %6, %1 : vector<8x256xf32>
    %8 = arith.addf %4, %7 : vector<8x256xf32>
    %c0_7 = arith.constant 0 : index
    %c0_8 = arith.constant 0 : index
    %9 = vector.load %arg4[%c0_7, %c0_8] : memref<64x8xf32, #tpu.memory_space<vmem>>, vector<64x8xf32>
    %cst = arith.constant dense<0.000000e+00> : vector<64x256xf32>
    %10 = tpu.matmul %9, %8, %cst {dimension_numbers = #tpu.dot_dimension_numbers<[1], [0], [0], [1], [0, 0, 1, 1], [], []>} : vector<64x8xf32>, vector<8x256xf32>, vector<64x256xf32> -> vector<64x256xf32>
    %c0_9 = arith.constant 0 : index
    %c0_10 = arith.constant 0 : index
    %11 = vector.load %arg5[%c0_9, %c0_10] : memref<64x1xf32, #tpu.memory_space<vmem>>, vector<64x1xf32>
    %12 = vector.broadcast %11 : vector<64x1xf32> to vector<64x256xf32>
    %13 = arith.addf %10, %12 : vector<64x256xf32>
    %14 = arith.negf %13 : vector<64x256xf32>
    %15 = math.exp %14 : vector<64x256xf32>
    %cst_11 = arith.constant 1.000000e+00 : f32
    %16 = vector.broadcast %cst_11 : f32 to vector<64x256xf32>
    %17 = arith.addf %16, %15 : vector<64x256xf32>
    %18 = arith.divf %16, %17 : vector<64x256xf32>
    %19 = arith.mulf %13, %18 : vector<64x256xf32>
    %c0_12 = arith.constant 0 : index
    %c0_13 = arith.constant 0 : index
    %20 = vector.load %arg6[%c0_12, %c0_13] : memref<8x64xf32, #tpu.memory_space<vmem>>, vector<8x64xf32>
    %cst_14 = arith.constant dense<0.000000e+00> : vector<8x256xf32>
    %21 = tpu.matmul %20, %19, %cst_14 {dimension_numbers = #tpu.dot_dimension_numbers<[1], [0], [0], [1], [0, 0, 1, 1], [], []>} : vector<8x64xf32>, vector<64x256xf32>, vector<8x256xf32> -> vector<8x256xf32>
    %c0_15 = arith.constant 0 : index
    %c0_16 = arith.constant 0 : index
    %22 = vector.load %arg7[%c0_15, %c0_16] : memref<8x1xf32, #tpu.memory_space<vmem>>, vector<8x1xf32>
    %23 = vector.broadcast %22 : vector<8x1xf32> to vector<8x256xf32>
    %24 = arith.addf %21, %23 : vector<8x256xf32>
    %25 = arith.subf %1, %24 : vector<8x256xf32>
    %26 = arith.mulf %25, %25 : vector<8x256xf32>
    %27 = vector.shape_cast %26 : vector<8x256xf32> to vector<1x8x256xf32>
    %cst_17 = arith.constant dense<0.000000e+00> : vector<1xf32>
    %28 = vector.multi_reduction <add>, %27, %cst_17 [1, 2] : vector<1x8x256xf32> to vector<1xf32>
    %29 = vector.shape_cast %28 : vector<1xf32> to vector<1x1x1xf32>
    %30 = vector.extract %29[0, 0, 0] : f32 from vector<1x1x1xf32>
    %31 = vector.broadcast %30 : f32 to vector<1x1xf32>
    %cst_18 = arith.constant 4.8828125E-4 : f32
    %32 = vector.broadcast %cst_18 : f32 to vector<1x1xf32>
    %33 = arith.mulf %31, %32 : vector<1x1xf32>
    %c0_19 = arith.constant 0 : index
    %c0_20 = arith.constant 0 : index
    %34 = vector.load %arg8[%c0_19, %c0_20] : memref<1x1xf32, #tpu.memory_space<vmem>>, vector<1x1xf32>
    tpu.vector_store %arg8[%c0_19, %c0_20], %33 {strides = array<i32>} : memref<1x1xf32, #tpu.memory_space<vmem>>, vector<1x1xf32>,
    return
  }
}

</mosaic_0001>

<bundles_post_ra>
// kernel: tpu_custom_call.1
= control target key start
LH: loop header
LB: loop body
LE: loop exit
PB: predicated region body
PF: predicated region fallthrough
CT: control target
= control target key end

     0   :  { %v608_v1 = vmov 0   ;;  %s820_s0 = inlined_call_operand.vmem [shape: f32[8,256], index: 0, kind: input, shape index: {}]   ;;  %s821_s1 = inlined_call_operand.vmem [shape: f32[8,256], index: 1, kind: input, shape index: {}]   ;;  %s822_s2 = inlined_call_operand.vmem [shape: f32[8,1], index: 2, kind: input, shape index: {}]   ;;  %s823_s3 = inlined_call_operand.vmem [shape: f32[8,1], index: 3, kind: input, shape index: {}]   ;;  %s824_s4 = inlined_call_operand.vmem [shape: f32[64,8], index: 4, kind: input, shape index: {}]   ;;  %s825_s5 = inlined_call_operand.vmem [shape: f32[64,1], index: 5, kind: input, shape index: {}]   ;;  %s826_s6 = inlined_call_operand.vmem [shape: f32[8,64], index: 6, kind: input, shape index: {}]   ;;  %s827_s7 = inlined_call_operand.vmem [shape: f32[8,1], index: 7, kind: input, shape index: {}]   ;;  %s828_s8 = inlined_call_operand.hbm [shape: f32[1,1], index: 8, kind: output, shape index: {}]  }
   0x1   :  { %v34_v0 = vld [vmem:[%s822_s2] sm:$0xff]  ;;  %518 = vset.pattern.permute.xlu0 %v608_v1  ;;  %519 = vset.pattern.permute.xlu1 %v608_v1 }
   0x2   :  { %37 = vperm.xlu0 %518, %v34_v0  }
   0x3   :  { %13 = vsyncpa [#allocation3], 0  ;;  %v42_v2 = vld [vmem:[%s823_s3] sm:$0xff]  ;;  %v62_v3 = vld [vmem:[%s825_s5 + $0x10] sm:$0xff]  ;;  %v609_v5 = vmov 0.0   ;;  %vm108_vm0 = vcmask 64512  }
   0x4   :  { %v64_v4 = vld [vmem:[%s825_s5 + $0x20] sm:$0xff]  ;;  %197 = vmatprep.mubr.f32.mxu0 %v609_v5  ;;  %433 = vmatprep.mubr.f32.mxu1 %v609_v5  ;;  %v66_v6 = vld [vmem:[%s825_s5 + $0x30] sm:$0xff]  ;;  %v61_v9 = vld [vmem:[%s825_s5 + $0x8] sm:$0xff]  ;;  %vm365_vm1 = vcmask 523264   ;;  %vm456_vm2 = vcmask 0  }
   0x5   :  { %v359_v7 = vld [vmem:[%s827_s7] sm:$0xff]  ;;  %v63_v10 = vld [vmem:[%s825_s5 + $0x18] sm:$0xff]  ;;  %v65_v11 = vld [vmem:[%s825_s5 + $0x28] sm:$0xff] }
   0x6   :  { %45 = vperm.xlu0 %518, %v42_v2   ;;  %v60_v8 = vld [vmem:[%s825_s5] sm:$0xff]  ;;  %v67_v12 = vld [vmem:[%s825_s5 + $0x38] sm:$0xff]  ;;  %v31_v15 = vld [vmem:[%s820_s0 + $0x8] sm:$0xff] }
   0x7   :  { %70 = vperm.xlu1 %519, %v60_v8   ;;  %v30_v14 = vld [vmem:[%s820_s0] sm:$0xff]  ;;  %v703_v17 = vld [vmem:[%s821_s1 + $0x8] sm:$0xff]  ;;  %v54_v27 = vld [vmem:[%s824_s4 + $0x10] sm:$0xff] }
   0x8   :  { %v698_v16 = vld [vmem:[%s821_s1] sm:$0xff]  ;;  %v53_v26 = vld [vmem:[%s824_s4 + $0x8] sm:$0xff]  ;;  %v55_v28 = vld [vmem:[%s824_s4 + $0x18] sm:$0xff] }
   0x9   :  { %v52_v25 = vld [vmem:[%s824_s4] sm:$0xff]  ;;  %v57_v30 = vld [vmem:[%s824_s4 + $0x28] sm:$0xff]  ;;  %v58_v31 = vld [vmem:[%s824_s4 + $0x30] sm:$0xff] }
   0xa   :  { %80 = vperm.xlu0 %518, %v62_v3   ;;  %v56_v29 = vld [vmem:[%s824_s4 + $0x20] sm:$0xff]  ;;  %v59_v32 = vld [vmem:[%s824_s4 + $0x38] sm:$0xff] }
   0xb   :  { %75 = vperm.xlu1 %519, %v61_v9  }
   0xe   :  { %90 = vperm.xlu0 %518, %v64_v4  }
   0xf   :  { %85 = vperm.xlu1 %519, %v63_v10  }
  0x12   :  { %100 = vperm.xlu0 %518, %v66_v6  }
  0x13   :  { %95 = vperm.xlu1 %519, %v65_v11  }
  0x16   :  { %362 = vperm.xlu0 %518, %v359_v7  }
  0x17   :  { %105 = vperm.xlu1 %519, %v67_v12  }
  0x81   :  { %v38_v13 = vpop.permute.xlu0 %37 }
  0x82   :  { %v40_v19 = vmul.f32 %v38_v13, %v30_v14  ;;  %v41_v20 = vmul.f32 %v38_v13, %v31_v15 }
  0x85   :  { %v46_v18 = vpop.permute.xlu0 %45 }
  0x86   :  { %v48_v21 = vmul.f32 %v46_v18, %v698_v16  ;;  %v49_v22 = vmul.f32 %v46_v18, %v703_v17  ;;  %v71_v33 = vpop.permute.xlu1 %70 }
  0x88   :  { %v51_v23 = vadd.f32 %v49_v22, %v41_v20  ;;  %v50_v24 = vadd.f32 %v48_v21, %v40_v19 }
  0x89   :  { %v81_v46 = vpop.permute.xlu0 %80 }
  0x8a   :  { %133 = vmatprep.subr.mxu0 %v51_v23  ;;  %v76_v39 = vpop.permute.xlu1 %75 }
  0x8b   :  { %134 = vmatpush1.msra.mxu0 %v50_v24 }
  0x8c   :  { %472 = vmatmul.mubr.msk.f32.vlgmr.msra.gmra.mrb[0].mxu0 %vm108_vm0, %v52_v25 }
  0x8d   :  { %203 = vmatprep.mubr.f32.mxu0 %v609_v5  ;;  %v91_v62 = vpop.permute.xlu0 %90 }
  0x8e   :  { %v86_v53 = vpop.permute.xlu1 %85 }
  0x90   :  { %473 = vmatmul.mubr.msk.f32.gmra.mrb[2].mxu0 %vm108_vm0, %v53_v26 }
  0x91   :  { %209 = vmatprep.mubr.f32.mxu0 %v609_v5  ;;  %v101_v22 = vpop.permute.xlu0 %100 }
  0x92   :  { %v96_v10 = vpop.permute.xlu1 %95 }
  0x94   :  { %474 = vmatmul.mubr.msk.f32.gmra.mrb[4].mxu0 %vm108_vm0, %v54_v27 }
  0x95   :  { %215 = vmatprep.mubr.f32.mxu0 %v609_v5 }
  0x98   :  { %475 = vmatmul.mubr.msk.f32.gmra.mrb[6].mxu0 %vm108_vm0, %v55_v28 }
  0x99   :  { %221 = vmatprep.mubr.f32.mxu0 %v609_v5 }
  0x9c   :  { %476 = vmatmul.mubr.msk.f32.gmra.mrb[8].mxu0 %vm108_vm0, %v56_v29 }
  0x9d   :  { %227 = vmatprep.mubr.f32.mxu0 %v609_v5 }
  0xa0   :  { %477 = vmatmul.mubr.msk.f32.gmra.mrb[10].mxu0 %vm108_vm0, %v57_v30 }
  0xa1   :  { %233 = vmatprep.mubr.f32.mxu0 %v609_v5 }
  0xa4   :  { %478 = vmatmul.mubr.msk.f32.gmra.mrb[12].mxu0 %vm108_vm0, %v58_v31 }
  0xa5   :  { %239 = vmatprep.mubr.f32.mxu0 %v609_v5 }
  0xa8   :  { %479 = vmatmul.mubr.msk.f32.gmra.mrb[14].mxu0 %vm108_vm0, %v59_v32 }
 0x15f   :  { %v199_v34 = vpop.f32.mrb[0].mxu0 }
 0x160   :  { %v739_v35 = vadd.f32 %v199_v34, %v71_v33  ;;  %v201_v36 = vpop.f32.mrb[1].mxu0  ;;  %v106_v34 = vpop.permute.xlu1 %105 }
 0x161   :  { %v741_v37 = vadd.f32 %v201_v36, %v71_v33 }
 0x162   :  { %v480_v38 = vmul.f32 -1.442695, %v739_v35 }
 0x163   :  { %v481_v40 = vmul.f32 -1.442695, %v741_v37  ;;  %v205_v41 = vpop.f32.mrb[2].mxu0 }
 0x164   :  { %520 = vpow2.f32 %v480_v38  ;;  %v745_v42 = vadd.f32 %v205_v41, %v76_v39  ;;  %v207_v43 = vpop.f32.mrb[3].mxu0 }
 0x165   :  { %522 = vpow2.f32 %v481_v40  ;;  %v747_v44 = vadd.f32 %v207_v43, %v76_v39 }
 0x166   :  { %v482_v45 = vmul.f32 -1.442695, %v745_v42 }
 0x167   :  { %v483_v47 = vmul.f32 -1.442695, %v747_v44  ;;  %v211_v48 = vpop.f32.mrb[4].mxu0 }
 0x168   :  { %524 = vpow2.f32 %v482_v45  ;;  %v751_v49 = vadd.f32 %v211_v48, %v81_v46  ;;  %v213_v50 = vpop.f32.mrb[5].mxu0 }
 0x169   :  { %526 = vpow2.f32 %v483_v47  ;;  %v753_v51 = vadd.f32 %v213_v50, %v81_v46 }
 0x16a   :  { %v484_v52 = vmul.f32 -1.442695, %v751_v49 }
 0x16b   :  { %v485_v54 = vmul.f32 -1.442695, %v753_v51  ;;  %v217_v55 = vpop.f32.mrb[6].mxu0 }
 0x16c   :  { %528 = vpow2.f32 %v484_v52  ;;  %v757_v56 = vadd.f32 %v217_v55, %v86_v53  ;;  %v219_v57 = vpop.f32.mrb[7].mxu0 }
 0x16d   :  { %530 = vpow2.f32 %v485_v54  ;;  %v759_v58 = vadd.f32 %v219_v57, %v86_v53 }
 0x16e   :  { %v521_v59 = vpop.eup %520  ;;  %v486_v60 = vmul.f32 -1.442695, %v757_v56 }
 0x16f   :  { %v523_v61 = vpop.eup %522  ;;  %v294_v63 = vadd.f32 1.0, %v521_v59  ;;  %v487_v0 = vmul.f32 -1.442695, %v759_v58  ;;  %v223_v1 = vpop.f32.mrb[8].mxu0 }
 0x170   :  { %v295_v2 = vadd.f32 1.0, %v523_v61  ;;  %532 = vpow2.f32 %v486_v60  ;;  %v763_v3 = vadd.f32 %v223_v1, %v91_v62  ;;  %v225_v4 = vpop.f32.mrb[9].mxu0 }
 0x171   :  { %534 = vrcp.f32 %v294_v63  ;;  %v765_v5 = vadd.f32 %v225_v4, %v91_v62 }
 0x172   :  { %v525_v6 = vpop.eup %524  ;;  %536 = vrcp.f32 %v295_v2  ;;  %v488_v7 = vmul.f32 -1.442695, %v763_v3 }
 0x173   :  { %v527_v8 = vpop.eup %526  ;;  %v296_v9 = vadd.f32 1.0, %v525_v6  ;;  %538 = vpow2.f32 %v487_v0  ;;  %v489_v11 = vmul.f32 -1.442695, %v765_v5  ;;  %v229_v12 = vpop.f32.mrb[10].mxu0 }
 0x174   :  { %v297_v13 = vadd.f32 1.0, %v527_v8  ;;  %540 = vpow2.f32 %v488_v7  ;;  %v769_v14 = vadd.f32 %v229_v12, %v96_v10  ;;  %v231_v15 = vpop.f32.mrb[11].mxu0 }
 0x175   :  { %542 = vrcp.f32 %v296_v9  ;;  %v771_v18 = vadd.f32 %v231_v15, %v96_v10 }
 0x176   :  { %v529_v19 = vpop.eup %528  ;;  %544 = vrcp.f32 %v297_v13  ;;  %v490_v20 = vmul.f32 -1.442695, %v769_v14 }
 0x177   :  { %v531_v21 = vpop.eup %530  ;;  %v298_v23 = vadd.f32 1.0, %v529_v19  ;;  %546 = vpow2.f32 %v489_v11  ;;  %v491_v24 = vmul.f32 -1.442695, %v771_v18  ;;  %v235_v25 = vpop.f32.mrb[12].mxu0 }
 0x178   :  { %v299_v26 = vadd.f32 1.0, %v531_v21  ;;  %548 = vpow2.f32 %v490_v20  ;;  %v775_v27 = vadd.f32 %v235_v25, %v101_v22  ;;  %v237_v28 = vpop.f32.mrb[13].mxu0 }
 0x179   :  { %550 = vrcp.f32 %v298_v23  ;;  %v777_v29 = vadd.f32 %v237_v28, %v101_v22 }
 0x17a   :  { %v533_v30 = vpop.eup %532  ;;  %552 = vrcp.f32 %v299_v26  ;;  %v492_v31 = vmul.f32 -1.442695, %v775_v27 }
 0x17b   :  { %v535_v32 = vpop.eup %534  ;;  %v300_v33 = vadd.f32 1.0, %v533_v30  ;;  %554 = vpow2.f32 %v491_v24  ;;  %v493_v36 = vmul.f32 -1.442695, %v777_v29  ;;  %v241_v38 = vpop.f32.mrb[14].mxu0 }
 0x17c   :  { %v537_v39 = vpop.eup %536  ;;  %556 = vpow2.f32 %v492_v31  ;;  %v781_v40 = vadd.f32 %v241_v38, %v106_v34  ;;  %v243_v41 = vpop.f32.mrb[15].mxu0  ;;  %v342_v55 = vmul.f32 %v535_v32, %v739_v35 }
 0x17d   :  { %v539_v43 = vpop.eup %538  ;;  %558 = vrcp.f32 %v300_v33  ;;  %v783_v45 = vadd.f32 %v243_v41, %v106_v34  ;;  %v343_v60 = vmul.f32 %v537_v39, %v741_v37 }
 0x17e   :  { %v541_v46 = vpop.eup %540  ;;  %v301_v47 = vadd.f32 1.0, %v539_v43  ;;  %560 = vpow2.f32 %v493_v36  ;;  %v494_v48 = vmul.f32 -1.442695, %v781_v40 }
 0x17f   :  { %v543_v50 = vpop.eup %542  ;;  %v302_v52 = vadd.f32 1.0, %v541_v46  ;;  %v495_v53 = vmul.f32 -1.442695, %v783_v45 }
 0x180   :  { %v545_v54 = vpop.eup %544  ;;  %v344_v57 = vmul.f32 %v543_v50, %v745_v42  ;;  %562 = vrcp.f32 %v301_v47 }
 0x181   :  { %v547_v59 = vpop.eup %546  ;;  %564 = vrcp.f32 %v302_v52  ;;  %v345_v61 = vmul.f32 %v545_v54, %v747_v44 }
 0x182   :  { %v549_v62 = vpop.eup %548  ;;  %v303_v63 = vadd.f32 1.0, %v547_v59  ;;  %566 = vpow2.f32 %v494_v48  ;;  %v499_v0 = vpack.c.bf16 %v344_v57, %v342_v55 }
 0x183   :  { %v551_v1 = vpop.eup %550  ;;  %v304_v2 = vadd.f32 1.0, %v549_v62  ;;  %568 = vpow2.f32 %v495_v53  ;;  %v497_v4 = vpack.c.bf16 %v345_v61, %v343_v60 }
 0x184   :  { %v553_v6 = vpop.eup %552  ;;  %v346_v44 = vmul.f32 %v551_v1, %v751_v49 }
 0x185   :  { %v555_v7 = vpop.eup %554  ;;  %570 = vrcp.f32 %v304_v2  ;;  %498 = vmatprep.subr.bf16.mxu1 %v497_v4  ;;  %v347_v19 = vmul.f32 %v553_v6, %v753_v51 }
 0x186   :  { %v557_v35 = vpop.eup %556  ;;  %572 = vrcp.f32 %v303_v63  ;;  %v305_v42 = vadd.f32 1.0, %v555_v7  ;;  %500 = vmatpush1.bf16.msra.mxu1 %v499_v0 }
 0x187   :  { %v559_v8 = vpop.eup %558  ;;  %v306_v10 = vadd.f32 1.0, %v557_v35 }
 0x188   :  { %v561_v37 = vpop.eup %560  ;;  %v348_v9 = vmul.f32 %v559_v8, %v757_v56  ;;  %574 = vrcp.f32 %v305_v42 }
 0x189   :  { %v307_v12 = vadd.f32 1.0, %v561_v37  ;;  %576 = vrcp.f32 %v306_v10 }
 0x18a   :  { %v563_v11 = vpop.eup %562  ;;  %v503_v13 = vpack.c.bf16 %v348_v9, %v346_v44 }
 0x18b   :  { %v565_v15 = vpop.eup %564  ;;  %v349_v20 = vmul.f32 %v563_v11, %v759_v58  ;;  %578 = vrcp.f32 %v307_v12 }
 0x18c   :  { %v567_v21 = vpop.eup %566  ;;  %v350_v26 = vmul.f32 %v565_v15, %v763_v3 }
 0x18d   :  { %v569_v22 = vpop.eup %568  ;;  %v308_v23 = vadd.f32 1.0, %v567_v21  ;;  %v501_v24 = vpack.c.bf16 %v349_v20, %v347_v19 }
 0x18e   :  { %v309_v25 = vadd.f32 1.0, %v569_v22 }
 0x18f   :  { %v571_v49 = vpop.eup %570  ;;  %580 = vrcp.f32 %v308_v23  ;;  %502 = vmatprep.subr.bf16.mxu1 %v501_v24 }
 0x190   :  { %v573_v56 = vpop.eup %572  ;;  %v352_v28 = vmul.f32 %v571_v49, %v769_v14  ;;  %582 = vrcp.f32 %v309_v25  ;;  %504 = vmatpush1.bf16.msra.mxu1 %v503_v13 }
 0x191   :  { %v351_v58 = vmul.f32 %v573_v56, %v765_v5  ;;  %v358_v5 = vld [vmem:[%s826_s6] sm:$0xff]  ;;  %s610_s6 = smov [#allocation2]  }
 0x192   :  { %v575_v51 = vpop.eup %574  ;;  %v507_v30 = vpack.c.bf16 %v352_v28, %v350_v26  ;;  %s464_s22 = sshll.u32 %s610_s6, 4  ;;  %s465_s22 = int_to_ptr.vmem [resolvable:$true] %s464_s22 }
 0x193   :  { %v353_v31 = vmul.f32 %v575_v51, %v771_v18  ;;  %v577_v33 = vpop.eup %576  ;;  %v363_v18 = vpop.permute.xlu0 %362  ;;  %s584_s23 = scalar_lea.vmem %s465_s22, 16  ;;  %s588_s24 = scalar_lea.vmem %s465_s22, 32 }
 0x194   :  { %v354_v39 = vmul.f32 %v577_v33, %v775_v27  ;;  %p585_p0 = scmp.ne.s32.totalorder %s465_s22, %s584_s23  ;;  %p589_p1 = scmp.lt.s32.totalorder %s465_s22, %s465_s22 }
 0x195   :  { %v505_v32 = vpack.c.bf16 %v353_v31, %v351_v58  ;;  %v579_v34 = vpop.eup %578  ;;  %p590_p2 = scmp.lt.s32.totalorder %s588_s24, %s584_s23 }
 0x196   :  { %v355_v14 = vmul.f32 %v579_v34, %v777_v29 }
 0x197   :  { %506 = vmatprep.subr.bf16.mxu1 %v505_v32  ;;  %p591_p3 = por %p590_p2, %p589_p1 }
 0x198   :  { %508 = vmatpush1.bf16.msra.mxu1 %v507_v30 }
 0x199   :  { %v581_v36 = vpop.eup %580  ;;  %p592_p4 = pnand %p591_p3, %p585_p0 }
 0x19a   :  { %v583_v38 = vpop.eup %582  ;;  %v356_v3 = vmul.f32 %v581_v36, %v781_v40 }
 0x19b   :  { %v357_v41 = vmul.f32 %v583_v38, %v783_v45 }
 0x19c   :  { %v511_v43 = vpack.c.bf16 %v356_v3, %v354_v39 }
 0x19d   :  { %v509_v46 = vpack.c.bf16 %v357_v41, %v355_v14 }
 0x19f   :  { %510 = vmatprep.subr.bf16.mxu1 %v509_v46 }
 0x1a0   :  { %512 = vmatpush1.bf16.msra.mxu1 %v511_v43 }
 0x1a3   :  { %496 = vmatmul.mubr.msk.f32.vlgmr.msra.gmra.mrb[0].mxu1 %vm365_vm1, %v358_v5 }
 0x276   :  { %v435_v47 = vpop.f32.mrb[0].mxu1 }
 0x277   :  { %v436_v48 = vadd.f32 %v435_v47, %v363_v18  ;;  %v437_v27 = vpop.f32.mrb[1].mxu1 }
 0x278   :  { %v438_v50 = vadd.f32 %v437_v27, %v363_v18 }
 0x279   :  { %v440_v40 = vsub.f32 %v698_v16, %v436_v48 }
 0x27a   :  { %v441_v29 = vsub.f32 %v703_v17, %v438_v50 }
 0x27b   :  { %v442_v45 = vmul.f32 %v440_v40, %v440_v40 }
 0x27c   :  { %v443_v52 = vmul.f32 %v441_v29, %v441_v29 }
 0x27e   :  { %v444_v53 = vadd.f32 %v443_v52, %v442_v45 }
 0x280   :  { %445 = vadd.xlane.f32.xlu1 %v444_v53 }
 0x30d   :  { %v446_v54 = vpop.xlane.xlu1 %445 }
 0x30e   :  { %v447_v55 = vrot.slane %v446_v54, 4 }
 0x310   :  { %v448_v57 = vadd.f32 %v447_v55, %v446_v54 }
 0x312   :  { %v449_v59 = vrot.slane %v448_v57, 2 }
 0x314   :  { %v450_v60 = vadd.f32 %v449_v59, %v448_v57 }
 0x316   :  { %v451_v61 = vrot.slane %v450_v60, 1 }
 0x318   :  { %v452_v62 = vadd.f32 %v451_v61, %v450_v60 }
 0x31a   :  { %513 = vpush %v452_v62 }
 0x34b   :  { %s514_s7 = spop %513 }
 0x34c   :  { %v454_v63 = vstv %s514_s7 }
 0x34d   :  { %v455_v16 = vmul.f32 0.00048828125, %v454_v63 }
 0x34f   :  { %457 = vst.msk [vmem:[#allocation2] sm:$0x1] %vm456_vm2, %v455_v16 }
 0x350   :  { %595 = shalt.err (!%p592_p4)
}
 0x351   :  { %s596_s27 = scalar_lea.hbm %s828_s8, 16 }
 0x352   :  { %p597_p5 = scmp.ne.s32.totalorder %s828_s8, %s596_s27  ;;  %p600_p6 = scmp.lt.u32.totalorder %s596_s27, %s828_s8 }
 0x354   :  { %p602_p7 = pnand %p600_p6, %p597_p5 }
 0x356   :  { %605 = shalt.err (!%p602_p7)
}
 0x357   :  { %467 = dma.vmem_to_hbm [thread:$0]  %s465_s22, 16, %s828_s8, [#allocation3]  }
 0x358   :  { %606 = dma.done.wait [#allocation3], 16  }
 0x359   :  { %607 = vsyncadd [#allocation3], 4294967280 }
 0x35a   :  { %471 = vsyncpa [#allocation3], 1 }

</bundles_post_ra>
